<compile_context>
chip_gen: v7x
topology: tpu7x:2x2x1
jax: 0.10.0
libtpu: 0.0.40
codegen_flags: <defaults>
</compile_context>

<pallas_src>
import functools

import jax
import jax.numpy as jnp
from jax import lax
from jax.experimental import pallas as pl
from jax.experimental.pallas import tpu as pltpu

_LN_EPS = 1e-5


def _round_up(x, m):
    return (x + m - 1) // m * m


def _attribute_net_kernel(s_ref, t_ref, w1s_ref, w1t_ref, b1_ref, w2_ref, b2_ref,
                          o_ref, *, inv_d):
    # s_ref: [tb, S] f32   t_ref: [tb, T] f32  -- the two halves of the (virtual) concat.
    s = s_ref[...]
    t = t_ref[...]

    # ---- LayerNorm statistics over the virtually-concatenated feature axis (eps=1e-5) ----
    # Two-pass variance: numerically safe, and garbage rows from a ragged last block can't
    # produce negative variance.
    mean = (jnp.sum(s, axis=-1, keepdims=True) +
            jnp.sum(t, axis=-1, keepdims=True)) * inv_d
    ds = s - mean
    dt = t - mean
    var = (jnp.sum(ds * ds, axis=-1, keepdims=True) +
           jnp.sum(dt * dt, axis=-1, keepdims=True)) * inv_d
    scale = lax.rsqrt(var + _LN_EPS)                  # [tb, 1], EUP rsqrt

    # gamma/beta are folded into fc1's weights/bias at pack time, so only normalize here.
    xs = ds * scale
    xt = dt * scale

    # ---- fc1 + ReLU : contraction split across the two input blocks (no in-kernel concat) ----
    h = (jnp.dot(xs, w1s_ref[...], preferred_element_type=jnp.float32)
         + jnp.dot(xt, w1t_ref[...], preferred_element_type=jnp.float32)
         + b1_ref[...])
    h = jnp.maximum(h, 0.0)

    # ---- fc3 + ReLU (store the true 16-wide output; HBM writeback is un-padded) ----
    out = jnp.dot(h, w2_ref[...], preferred_element_type=jnp.float32) + b2_ref[...]
    o_ref[...] = jnp.maximum(out, 0.0)


def _choose_tile(batch, tile_b):
    """Batch tile: multiple of 8 (sublane); capped at ~ceil(B/2) so a 2-TC chip (v7x) gets
    at least two grid steps whenever the batch is large enough."""
    half = _round_up(max(1, -(-batch // 2)), 8)
    return max(8, min(_round_up(tile_b, 8), half))


def attribute_network_forward(state, threshold_vector, packed, *, tile_b=2048):
    """Pallas forward. state: [B, S] f32, threshold_vector: [B, T] f32 -> [B, A] f32."""
    B, S = state.shape
    Bt, T = threshold_vector.shape
    assert Bt == B
    D = S + T
    H = packed["w1s"].shape[1]
    A = packed["w2"].shape[1]

    tb = _choose_tile(B, tile_b)
    grid = (pl.cdiv(B, tb),)          # ragged last block: OOB reads are garbage, OOB writes dropped

    def tiled(cols):                  # batch-tiled operand (pipelined per grid step)
        return pl.BlockSpec((tb, cols), lambda i: (i, 0))

    def resident(shape):              # constant block index -> stays resident in VMEM
        return pl.BlockSpec(shape, lambda i: (0, 0))

    cost = pl.CostEstimate(
        flops=2 * B * (D * H + H * A),
        transcendentals=B,                                 # one rsqrt per row
        bytes_accessed=4 * B * (S + T + A)                 # activations in/out (un-padded)
                       + 4 * (D * H + H * A + H + A),      # f32 weights/biases (read once)
    )

    kernel = functools.partial(_attribute_net_kernel, inv_d=1.0 / D)

    return pl.pallas_call(
        kernel,
        out_shape=jax.ShapeDtypeStruct((B, A), jnp.float32),
        grid=grid,
        in_specs=[
            tiled(S),                 # state rows
            tiled(T),                 # threshold rows
            resident((S, H)),         # fc1 weight rows for the state slice (gamma folded in)
            resident((T, H)),         # fc1 weight rows for the threshold slice (gamma folded in)
            resident((1, H)),         # fc1 bias (beta folded in)
            resident((H, A)),         # fc3 weight
            resident((1, A)),         # fc3 bias
        ],
        out_specs=tiled(A),
        compiler_params=pltpu.CompilerParams(
            dimension_semantics=("parallel",),             # v7x: shard batch steps over both TCs
            vmem_limit_bytes=32 * 1024 * 1024,             # headroom on v5e (16 MiB default)
        ),
        cost_estimate=cost,
    )(state, threshold_vector,
      packed["w1s"], packed["w1t"], packed["b1"], packed["w2"], packed["b2"])


def init_params(key, state_size, threshold_vector_size, number_of_attributes, hidden_size=32):
    """Logical (PyTorch-shaped, weights transposed to [in, out]) f32 parameters."""
    D = state_size + threshold_vector_size
    k1, k2, k3, k4 = jax.random.split(key, 4)
    bound1 = 1.0 / float(D) ** 0.5
    bound2 = 1.0 / float(hidden_size) ** 0.5
    return {
        "gamma": jnp.ones((D,), jnp.float32),
        "beta": jnp.zeros((D,), jnp.float32),
        "w1": jax.random.uniform(k1, (D, hidden_size), jnp.float32, -bound1, bound1),
        "b1": jax.random.uniform(k2, (hidden_size,), jnp.float32, -bound1, bound1),
        "w2": jax.random.uniform(k3, (hidden_size, number_of_attributes), jnp.float32,
                                 -bound2, bound2),
        "b2": jax.random.uniform(k4, (number_of_attributes,), jnp.float32, -bound2, bound2),
    }


def pack_params(params, state_size):
    """One-time packing:
       * fold LayerNorm affine into fc1:  w1' = diag(gamma) @ w1,  b1' = beta @ w1 + b1
       * split fc1 rows across the concat boundary so no [B, D] concat is ever materialized.
    Everything stays f32 (no H/A padding needed; hidden/out widths are tiny and VMEM-resident)."""
    D, H = params["w1"].shape
    A = params["w2"].shape[1]
    S = state_size
    w1g = params["gamma"][:, None] * params["w1"]
    b1g = params["beta"] @ params["w1"] + params["b1"]
    return {
        "w1s": w1g[:S],
        "w1t": w1g[S:],
        "b1": b1g.reshape(1, H),
        "w2": params["w2"],
        "b2": params["b2"].reshape(1, A),
    }


def reference_forward(state, threshold_vector, params):
    """Pure-JAX f32 reference matching the PyTorch forward."""
    x = jnp.concatenate([state, threshold_vector], axis=-1)
    mean = jnp.mean(x, axis=-1, keepdims=True)
    var = jnp.mean((x - mean) ** 2, axis=-1, keepdims=True)
    xn = (x - mean) / jnp.sqrt(var + _LN_EPS)
    xn = xn * params["gamma"] + params["beta"]
    h = jnp.maximum(xn @ params["w1"] + params["b1"], 0.0)
    return jnp.maximum(h @ params["w2"] + params["b2"], 0.0)


# TODO(synk): get_attributes_vector's Xe_vect=True branch is a host-side Python loop building
# one-hot threshold vectors; it is orchestration around this forward, not a kernel, so it is
# left to plain JAX (vmap over one-hot rows) rather than faked inside the Pallas kernel.


if __name__ == "__main__":
    # Small shapes consistent with the module: batch=8, state=20, threshold=12,
    # hidden=32, number_of_attributes=16.
    B, S, T, H, A = 8, 20, 12, 32, 16

    key = jax.random.PRNGKey(0)
    kp, kg, kb, ks, kt = jax.random.split(key, 5)

    params = init_params(kp, state_size=S, threshold_vector_size=T,
                         number_of_attributes=A, hidden_size=H)
    # Non-trivial gamma/beta so the LN-affine folding into fc1 is actually exercised.
    params["gamma"] = 1.0 + 0.1 * jax.random.normal(kg, (S + T,), jnp.float32)
    params["beta"] = 0.1 * jax.random.normal(kb, (S + T,), jnp.float32)

    packed = pack_params(params, state_size=S)

    state = jax.random.normal(ks, (B, S), jnp.float32)
    threshold_vector = jax.random.normal(kt, (B, T), jnp.float32)

    out = attribute_network_forward(state, threshold_vector, packed)
    out = jax.block_until_ready(out)

    ref = reference_forward(state, threshold_vector, params)
    assert out.shape == (B, A)
    assert jnp.allclose(out, ref, atol=2e-2, rtol=2e-2), "mismatch vs reference"

    print("KERNEL_OK")
</pallas_src>

<mosaic_0001>
module attributes {stable_mosaic.version = 11 : i64} {
  func.func @_attribute_net_kernel(%arg0: i32, %arg1: memref<8x20xf32, #tpu.memory_space<vmem>>, %arg2: memref<8x12xf32, #tpu.memory_space<vmem>>, %arg3: memref<20x32xf32, #tpu.memory_space<vmem>>, %arg4: memref<12x32xf32, #tpu.memory_space<vmem>>, %arg5: memref<1x32xf32, #tpu.memory_space<vmem>>, %arg6: memref<32x16xf32, #tpu.memory_space<vmem>>, %arg7: memref<1x16xf32, #tpu.memory_space<vmem>>, %arg8: memref<8x16xf32, #tpu.memory_space<vmem>>) attributes {dimension_semantics = [#tpu.dimension_semantics<parallel>], iteration_bounds = array<i64: 1>, scalar_prefetch = 0 : i64, scratch_operands = 0 : i64, tpu.core_type = #tpu.core_type<tc>, window_params = [{transform_indices = @transform_0, window_bounds = array<i64: 8, 20>}, {transform_indices = @transform_1, window_bounds = array<i64: 8, 12>}, {pipeline_mode = #tpu.pipeline_mode<synchronous>, transform_indices = @transform_2, window_bounds = array<i64: 20, 32>}, {pipeline_mode = #tpu.pipeline_mode<synchronous>, transform_indices = @transform_3, window_bounds = array<i64: 12, 32>}, {pipeline_mode = #tpu.pipeline_mode<synchronous>, transform_indices = @transform_4, window_bounds = array<i64: 1, 32>}, {pipeline_mode = #tpu.pipeline_mode<synchronous>, transform_indices = @transform_5, window_bounds = array<i64: 32, 16>}, {pipeline_mode = #tpu.pipeline_mode<synchronous>, transform_indices = @transform_6, window_bounds = array<i64: 1, 16>}, {transform_indices = @transform_7, window_bounds = array<i64: 8, 16>}]} {
    %c0 = arith.constant 0 : index
    %c0_0 = arith.constant 0 : index
    %0 = vector.load %arg1[%c0, %c0_0] : memref<8x20xf32, #tpu.memory_space<vmem>>, vector<8x20xf32>
    %c0_1 = arith.constant 0 : index
    %c0_2 = arith.constant 0 : index
    %1 = vector.load %arg2[%c0_1, %c0_2] : memref<8x12xf32, #tpu.memory_space<vmem>>, vector<8x12xf32>
    %cst = arith.constant dense<0.000000e+00> : vector<8xf32>
    %2 = vector.multi_reduction <add>, %0, %cst [1] : vector<8x20xf32> to vector<8xf32>
    %3 = vector.shape_cast %2 : vector<8xf32> to vector<8x1xf32>
    %cst_3 = arith.constant dense<0.000000e+00> : vector<8xf32>
    %4 = vector.multi_reduction <add>, %1, %cst_3 [1] : vector<8x12xf32> to vector<8xf32>
    %5 = vector.shape_cast %4 : vector<8xf32> to vector<8x1xf32>
    %6 = arith.addf %3, %5 : vector<8x1xf32>
    %cst_4 = arith.constant 3.125000e-02 : f32
    %7 = vector.broadcast %cst_4 : f32 to vector<8x1xf32>
    %8 = arith.mulf %6, %7 : vector<8x1xf32>
    %9 = vector.broadcast %8 : vector<8x1xf32> to vector<8x20xf32>
    %10 = arith.subf %0, %9 : vector<8x20xf32>
    %11 = vector.broadcast %8 : vector<8x1xf32> to vector<8x12xf32>
    %12 = arith.subf %1, %11 : vector<8x12xf32>
    %13 = arith.mulf %10, %10 : vector<8x20xf32>
    %cst_5 = arith.constant dense<0.000000e+00> : vector<8xf32>
    %14 = vector.multi_reduction <add>, %13, %cst_5 [1] : vector<8x20xf32> to vector<8xf32>
    %15 = vector.shape_cast %14 : vector<8xf32> to vector<8x1xf32>
    %16 = arith.mulf %12, %12 : vector<8x12xf32>
    %cst_6 = arith.constant dense<0.000000e+00> : vector<8xf32>
    %17 = vector.multi_reduction <add>, %16, %cst_6 [1] : vector<8x12xf32> to vector<8xf32>
    %18 = vector.shape_cast %17 : vector<8xf32> to vector<8x1xf32>
    %19 = arith.addf %15, %18 : vector<8x1xf32>
    %cst_7 = arith.constant 3.125000e-02 : f32
    %20 = vector.broadcast %cst_7 : f32 to vector<8x1xf32>
    %21 = arith.mulf %19, %20 : vector<8x1xf32>
    %cst_8 = arith.constant 9.99999974E-6 : f32
    %22 = vector.broadcast %cst_8 : f32 to vector<8x1xf32>
    %23 = arith.addf %21, %22 : vector<8x1xf32>
    %24 = math.rsqrt %23 : vector<8x1xf32>
    %25 = vector.broadcast %24 : vector<8x1xf32> to vector<8x20xf32>
    %26 = arith.mulf %10, %25 : vector<8x20xf32>
    %27 = vector.broadcast %24 : vector<8x1xf32> to vector<8x12xf32>
    %28 = arith.mulf %12, %27 : vector<8x12xf32>
    %c0_9 = arith.constant 0 : index
    %c0_10 = arith.constant 0 : index
    %29 = vector.load %arg3[%c0_9, %c0_10] : memref<20x32xf32, #tpu.memory_space<vmem>>, vector<20x32xf32>
    %cst_11 = arith.constant dense<0.000000e+00> : vector<8x32xf32>
    %30 = tpu.matmul %26, %29, %cst_11 {dimension_numbers = #tpu.dot_dimension_numbers<[1], [0], [0], [1], [0, 0, 1, 1], [], []>} : vector<8x20xf32>, vector<20x32xf32>, vector<8x32xf32> -> vector<8x32xf32>
    %c0_12 = arith.constant 0 : index
    %c0_13 = arith.constant 0 : index
    %31 = vector.load %arg4[%c0_12, %c0_13] : memref<12x32xf32, #tpu.memory_space<vmem>>, vector<12x32xf32>
    %cst_14 = arith.constant dense<0.000000e+00> : vector<8x32xf32>
    %32 = tpu.matmul %28, %31, %cst_14 {dimension_numbers = #tpu.dot_dimension_numbers<[1], [0], [0], [1], [0, 0, 1, 1], [], []>} : vector<8x12xf32>, vector<12x32xf32>, vector<8x32xf32> -> vector<8x32xf32>
    %33 = arith.addf %30, %32 : vector<8x32xf32>
    %c0_15 = arith.constant 0 : index
    %c0_16 = arith.constant 0 : index
    %34 = vector.load %arg5[%c0_15, %c0_16] : memref<1x32xf32, #tpu.memory_space<vmem>>, vector<1x32xf32>
    %35 = vector.broadcast %34 : vector<1x32xf32> to vector<8x32xf32>
    %36 = arith.addf %33, %35 : vector<8x32xf32>
    %cst_17 = arith.constant 0.000000e+00 : f32
    %37 = vector.broadcast %cst_17 : f32 to vector<8x32xf32>
    %38 = arith.maximumf %36, %37 : vector<8x32xf32>
    %c0_18 = arith.constant 0 : index
    %c0_19 = arith.constant 0 : index
    %39 = vector.load %arg6[%c0_18, %c0_19] : memref<32x16xf32, #tpu.memory_space<vmem>>, vector<32x16xf32>
    %cst_20 = arith.constant dense<0.000000e+00> : vector<8x16xf32>
    %40 = tpu.matmul %38, %39, %cst_20 {dimension_numbers = #tpu.dot_dimension_numbers<[1], [0], [0], [1], [0, 0, 1, 1], [], []>} : vector<8x32xf32>, vector<32x16xf32>, vector<8x16xf32> -> vector<8x16xf32>
    %c0_21 = arith.constant 0 : index
    %c0_22 = arith.constant 0 : index
    %41 = vector.load %arg7[%c0_21, %c0_22] : memref<1x16xf32, #tpu.memory_space<vmem>>, vector<1x16xf32>
    %42 = vector.broadcast %41 : vector<1x16xf32> to vector<8x16xf32>
    %43 = arith.addf %40, %42 : vector<8x16xf32>
    %cst_23 = arith.constant 0.000000e+00 : f32
    %44 = vector.broadcast %cst_23 : f32 to vector<8x16xf32>
    %45 = arith.maximumf %43, %44 : vector<8x16xf32>
    %c0_24 = arith.constant 0 : index
    %c0_25 = arith.constant 0 : index
    %46 = vector.load %arg8[%c0_24, %c0_25] : memref<8x16xf32, #tpu.memory_space<vmem>>, vector<8x16xf32>
    tpu.vector_store %arg8[%c0_24, %c0_25], %45 {strides = array<i32>} : memref<8x16xf32, #tpu.memory_space<vmem>>, vector<8x16xf32>,
    return
  }
  func.func @transform_0(%arg0: i32) -> (i32, i32) {
    %c0_i32 = arith.constant 0 : i32
    %c0_i32_0 = arith.constant 0 : i32
    return %arg0, %c0_i32 : i32, i32
  }
  func.func @transform_1(%arg0: i32) -> (i32, i32) {
    %c0_i32 = arith.constant 0 : i32
    %c0_i32_0 = arith.constant 0 : i32
    return %arg0, %c0_i32 : i32, i32
  }
  func.func @transform_2(%arg0: i32) -> (i32, i32) {
    %c0_i32 = arith.constant 0 : i32
    %c0_i32_0 = arith.constant 0 : i32
    %c0_i32_1 = arith.constant 0 : i32
    return %c0_i32, %c0_i32_0 : i32, i32
  }
  func.func @transform_3(%arg0: i32) -> (i32, i32) {
    %c0_i32 = arith.constant 0 : i32
    %c0_i32_0 = arith.constant 0 : i32
    %c0_i32_1 = arith.constant 0 : i32
    return %c0_i32, %c0_i32_0 : i32, i32
  }
  func.func @transform_4(%arg0: i32) -> (i32, i32) {
    %c0_i32 = arith.constant 0 : i32
    %c0_i32_0 = arith.constant 0 : i32
    %c0_i32_1 = arith.constant 0 : i32
    return %c0_i32, %c0_i32_0 : i32, i32
  }
  func.func @transform_5(%arg0: i32) -> (i32, i32) {
    %c0_i32 = arith.constant 0 : i32
    %c0_i32_0 = arith.constant 0 : i32
    %c0_i32_1 = arith.constant 0 : i32
    return %c0_i32, %c0_i32_0 : i32, i32
  }
  func.func @transform_6(%arg0: i32) -> (i32, i32) {
    %c0_i32 = arith.constant 0 : i32
    %c0_i32_0 = arith.constant 0 : i32
    %c0_i32_1 = arith.constant 0 : i32
    return %c0_i32, %c0_i32_0 : i32, i32
  }
  func.func @transform_7(%arg0: i32) -> (i32, i32) {
    %c0_i32 = arith.constant 0 : i32
    %c0_i32_0 = arith.constant 0 : i32
    return %arg0, %c0_i32 : i32, i32
  }
}

</mosaic_0001>

<bundles_post_ra>
// kernel: tpu_custom_call.1
= control target key start
LH: loop header
LB: loop body
LE: loop exit
PB: predicated region body
PF: predicated region fallthrough
CT: control target
= control target key end

     0   :  { %12 = vsyncpa [#allocation3], 0  ;;  %s569_s0 = inlined_call_operand.vmem [shape: f32[8,20], index: 0, kind: input, shape index: {}]   ;;  %s570_s1 = inlined_call_operand.hbm [shape: f32[8,12], index: 1, kind: input, shape index: {}]   ;;  %s571_s2 = inlined_call_operand.vmem [shape: f32[20,32], index: 2, kind: input, shape index: {}]   ;;  %s572_s3 = inlined_call_operand.vmem [shape: f32[12,32], index: 3, kind: input, shape index: {}]   ;;  %s573_s4 = inlined_call_operand.vmem [shape: f32[1,32], index: 4, kind: input, shape index: {}]   ;;  %s574_s5 = inlined_call_operand.vmem [shape: f32[32,16], index: 5, kind: input, shape index: {}]   ;;  %s575_s6 = inlined_call_operand.vmem [shape: f32[1,16], index: 6, kind: input, shape index: {}]   ;;  %s576_s7 = inlined_call_operand.hbm [shape: f32[8,16], index: 7, kind: output, shape index: {}]  }
   0x1   :  { %13 = vsyncpa [#allocation4], 0  ;;  %s452_s24 = smov [#allocation2]   ;;  %s404_s28 = scalar_lea.hbm %s570_s1, 128 }
   0x2   :  { %s22_s25 = sshll.u32 %s452_s24, 4  ;;  %p405_p0 = scmp.ne.s32.totalorder %s570_s1, %s404_s28  ;;  %s23_s25 = int_to_ptr.vmem [resolvable:$true] %s22_s25 }
   0x3   :  { %p408_p1 = scmp.lt.u32.totalorder %s404_s28, %s570_s1 }
   0x5   :  { %p410_p2 = pnand %p408_p1, %p405_p0 }
   0x7   :  { %413 = shalt.err (!%p410_p2)
}
   0x8   :  { %s414_s10 = scalar_lea.vmem %s23_s25, 128  ;;  %p419_p4 = scmp.lt.s32.totalorder %s23_s25, %s23_s25 }
   0x9   :  { %p415_p3 = scmp.ne.s32.totalorder %s23_s25, %s414_s10  ;;  %p420_p5 = scmp.lt.s32.totalorder %s414_s10, %s414_s10 }
   0xb   :  { %p421_p6 = por %p420_p5, %p419_p4 }
   0xd   :  { %p422_p7 = pnand %p421_p6, %p415_p3 }
   0xf   :  { %425 = shalt.err (!%p422_p7)
}
  0x10   :  { %25 = dma.hbm_to_vmem [thread:$0]  %s570_s1, 128, %s23_s25, [#allocation3]  }
  0x11   :  { %448 = dma.done.wait [#allocation3], 128  }
  0x12   :  { %449 = vsyncadd [#allocation3], 4294967168  ;;  %vm41_vm0 = vcmask 162816   ;;  %v39_v0 = vld [vmem:[%s569_s0] sm:$0xff]  ;;  %vm45_vm1 = vcmask 97280   ;;  %vm75_vm2 = vcmask 1043456  }
  0x13   :  { %v40_v1 = vld [vmem:[#allocation2] sm:$0xff]  ;;  %v42_v2 = vsel %vm41_vm0, %v39_v0, 0.0  ;;  %v71_v15 = vld [vmem:[%s572_s3 + $0x8] sm:$0xf]  ;;  %v453_v16 = vmov 0.0|0.0   ;;  %vm454_vm3 = vmmov 1  }
  0x14   :  { %43 = vadd.xlane.f32.xlu0 %v42_v2  ;;  %v46_v3 = vsel %vm45_vm1, %v40_v1, 0.0  ;;  %v70_v14 = vld [vmem:[%s572_s3] sm:$0xff]  ;;  %383 = vmatprep.subr.bf16.mxu1 %v453_v16  ;;  %vm385_vm4 = vmpackc.low %vm75_vm2, %vm454_vm3  ;;  %vm455_vm5 = vmmov 0   ;;  %v456_v18 = vmov 0.0   ;;  %v68_v25 = vld [vmem:[%s571_s2 + $0x8] sm:$0xff]  ;;  %vm245_vm6 = vcmask 261120  }
  0x15   :  { %v384_v17 = vpack.c.bf16 %v71_v15, %v70_v14  ;;  %390 = vmatprep.subr.bf16.mxu0 %v453_v16  ;;  %360 = vmatprep.mubr.msk.f32.mxu1 %vm455_vm5, %v456_v18  ;;  %v67_v24 = vld [vmem:[%s571_s2] sm:$0xff]  ;;  %v69_v29 = vld [vmem:[%s571_s2 + $0x10] sm:$0xf]  ;;  %v235_v32 = vld [vmem:[%s574_s5 + $0x8] sm:$0xff]  ;;  %vm320_vm7 = vcmask 130048  }
  0x16   :  { %380 = vmatprep.mubr.msk.f32.mxu0 %vm455_vm5, %v456_v18  ;;  %v388_v27 = vpack.c.bf16 %v68_v25, %v67_v24  ;;  %v234_v31 = vld [vmem:[%s574_s5] sm:$0xff]  ;;  %v236_v34 = vld [vmem:[%s574_s5 + $0x10] sm:$0xff]  ;;  %v237_v35 = vld [vmem:[%s574_s5 + $0x18] sm:$0xff]  ;;  %s457_s5 = smov [#allocation5]  }
  0x17   :  { %386 = vmatpush3.bf16.msk.msra.mxu1 %vm385_vm4, %v384_v17  ;;  %v391_v33 = vpack.c.bf16 %v235_v32, %v234_v31  ;;  %v394_v36 = vpack.c.bf16 %v237_v35, %v236_v34  ;;  %v341_v40 = vld [vmem:[%s573_s4] ss:$0 sm:$0xff]  ;;  %s328_s10 = sshll.u32 %s457_s5, 4  ;;  %s329_s10 = int_to_ptr.vmem [resolvable:$true] %s328_s10 }
  0x18   :  { %47 = vadd.xlane.f32.xlu0 %v46_v3  ;;  %387 = vmatprep.subr.bf16.mxu1 %v453_v16  ;;  %v342_v45 = vld [vmem:[%s575_s6] ss:$0 sm:$0xff]  ;;  %s426_s4 = scalar_lea.vmem %s329_s10, 128  ;;  %p431_p9 = scmp.lt.s32.totalorder %s329_s10, %s329_s10 }
  0x19   :  { %392 = vmatpush3.bf16.msra.mxu0 %v391_v33  ;;  %p427_p8 = scmp.ne.s32.totalorder %s329_s10, %s426_s4  ;;  %p432_p10 = scmp.lt.s32.totalorder %s426_s4, %s426_s4 }
  0x1a   :  { %393 = vmatprep.subr.bf16.mxu0 %v453_v16 }
  0x1b   :  { %p433_p11 = por %p432_p10, %p431_p9 }
  0x1d   :  { %395 = vmatpush3.bf16.msra.mxu0 %v394_v36  ;;  %p434_p12 = pnand %p433_p11, %p427_p8 }
  0xa1   :  { %v44_v4 = vpop.xlane.xlu0 %43 }
  0xa5   :  { %v48_v5 = vpop.xlane.xlu0 %47 }
  0xa6   :  { %v49_v6 = vadd.f32 %v48_v5, %v44_v4 }
  0xa8   :  { %v50_v7 = vmul.f32 0.03125, %v49_v6 }
  0xaa   :  { %v51_v8 = vsub.f32 %v39_v0, %v50_v7  ;;  %v52_v9 = vsub.f32 %v40_v1, %v50_v7 }
  0xac   :  { %v53_v10 = vmul.f32 %v51_v8, %v51_v8  ;;  %v57_v12 = vmul.f32 %v52_v9, %v52_v9 }
  0xae   :  { %v54_v11 = vsel %vm41_vm0, %v53_v10, 0.0  ;;  %v58_v13 = vsel %vm45_vm1, %v57_v12, 0.0 }
  0xaf   :  { %55 = vadd.xlane.f32.xlu1 %v54_v11 }
  0xb3   :  { %59 = vadd.xlane.f32.xlu1 %v58_v13 }
 0x13c   :  { %v56_v19 = vpop.xlane.xlu1 %55 }
 0x140   :  { %v60_v20 = vpop.xlane.xlu1 %59 }
 0x141   :  { %v61_v21 = vadd.f32 %v60_v20, %v56_v19 }
 0x143   :  { %v62_v22 = vmul.f32 0.03125, %v61_v21 }
 0x145   :  { %v63_v23 = vadd.f32 1e-05, %v62_v22 }
 0x147   :  { %402 = vrsqrt.f32 %v63_v23 }
 0x151   :  { %v403_v26 = vpop.eup %402 }
 0x152   :  { %v66_v28 = vmul.f32 %v403_v26, %v52_v9  ;;  %v65_v30 = vmul.f32 %v403_v26, %v51_v8 }
 0x154   :  { %361 = vmatmul.mubr.msk.f32.vlgmr.msra.gmra.mrb[0].mxu1 %vm45_vm1, %v66_v28 }
 0x155   :  { %389 = vmatpush3.bf16.msra.mxu1 %v388_v27  ;;  %369 = vmatprep.mubr.msk.f32.mxu1 %vm455_vm5, %v456_v18 }
 0x156   :  { %367 = vmatprep.subr.mxu1 %v456_v18 }
 0x159   :  { %368 = vmatpush3.msk.msra.mxu1 %vm75_vm2, %v69_v29 }
 0x15a   :  { %370 = vmatmul.mubr.msk.f32.vlgmr.msra.gmra.mrb[2].mxu1 %vm41_vm0, %v65_v30 }
 0x227   :  { %v145_v37 = vpop.f32.mrb[0].mxu1 }
 0x228   :  { %v362_v38 = vpop.f32.mrb[1].mxu1 }
 0x22d   :  { %v221_v39 = vpop.f32.mrb[2].mxu1 }
 0x22e   :  { %v222_v41 = vadd.f32 %v221_v39, %v145_v37  ;;  %v371_v42 = vpop.f32.mrb[3].mxu1 }
 0x230   :  { %v232_v43 = vadd.f32 %v341_v40, %v222_v41 }
 0x232   :  { %v233_v44 = vmax.f32 %v232_v43, 0.0 }
 0x234   :  { %381 = vmatmul.mubr.msk.f32.vlgmr.msra.gmra.mrb[0].mxu0 %vm245_vm6, %v233_v44 }
 0x307   :  { %v315_v46 = vpop.f32.mrb[0].mxu0 }
 0x308   :  { %v316_v47 = vadd.f32 %v342_v45, %v315_v46  ;;  %v382_v48 = vpop.f32.mrb[1].mxu0 }
 0x30a   :  { %v319_v49 = vmax.f32 %v316_v47, 0.0 }
 0x30c   :  { %321 = vst.msk [vmem:[#allocation5] sm:$0xff] %vm320_vm7, %v319_v49 }
 0x30d   :  { %437 = shalt.err (!%p434_p12)
}
 0x30e   :  { %s438_s6 = scalar_lea.hbm %s576_s7, 128 }
 0x30f   :  { %p439_p13 = scmp.ne.s32.totalorder %s576_s7, %s438_s6  ;;  %p442_p0 = scmp.lt.u32.totalorder %s438_s6, %s576_s7 }
 0x311   :  { %p444_p1 = pnand %p442_p0, %p439_p13 }
 0x313   :  { %447 = shalt.err (!%p444_p1)
}
 0x314   :  { %331 = dma.vmem_to_hbm [thread:$0]  %s329_s10, 128, %s576_s7, [#allocation4]  }
 0x315   :  { %450 = dma.done.wait [#allocation4], 128  }
 0x316   :  { %451 = vsyncadd [#allocation4], 4294967168 }
 0x317   :  { %335 = vsyncpa [#allocation3], 1 }
 0x318   :  { %336 = vsyncpa [#allocation4], 1 }

</bundles_post_ra>
